<compile_context>
chip_gen: v5e
topology: v5e:2x2
jax: 0.10.0
libtpu: 0.0.40
codegen_flags: <defaults>
</compile_context>

<pallas_src>
import functools

import jax
import jax.numpy as jnp
from jax.experimental import pallas as pl
from jax.experimental.pallas import tpu as pltpu


def _round_up(x, m):
    return ((x + m - 1) // m) * m


def _pick_tile(size, tile_max, align):
    """Largest tile (power-of-two multiple of `align`, <= tile_max) whose
    padding waste round_up(size, tile) - size stays small (<= ~12% or one
    alignment unit)."""
    size_a = _round_up(max(size, 1), align)
    best = align
    t = align
    while t * 2 <= tile_max:
        t *= 2
        if _round_up(size, t) - size <= max(size // 8, align):
            best = t
    return min(best, size_a)


def _decoder_kernel(x_ref, w1_ref, b1_ref, w2_ref, b2_ref, o_ref):
    # linear1 on the MXU: (tm, Lp)bf16 @ (Lp, Hp)bf16 -> f32.
    # TODO(synk): if v7x ever becomes compute-exposed here, cache
    # h = tanh(x@W1+b1) per row tile instead of recomputing per n tile
    # (requires the m axis outermost, which re-streams W2 -- bandwidth loses).
    h = jnp.dot(x_ref[...], w1_ref[...], preferred_element_type=jnp.float32)
    # bias + tanh in f32 (EUP).  Padded hidden lanes see tanh(0 + 0) = 0 and
    # the corresponding W2 rows are zero, so they contribute nothing below.
    h = jnp.tanh(h + b1_ref[...])
    # linear2 on the MXU: (tm, Hp)bf16 @ (Hp, tn)bf16 -> f32
    y = jnp.dot(h.astype(w2_ref.dtype), w2_ref[...],
                preferred_element_type=jnp.float32)
    o_ref[...] = (y + b2_ref[...]).astype(o_ref.dtype)


def prepare_decoder_params(w1, b1, w2, b2, *, tn=2048):
    """One-time prep: zero-pad contraction/output dims and cast weights to
    bf16.  Do this once at model init (NOT per forward call) -- padding/casting
    W2 (hidden x n_items) per call would double its HBM traffic.

    Returns (w1_p, b1_p, w2_p, b2_p, output, tn_eff)."""
    w1 = jnp.asarray(w1)
    b1 = jnp.asarray(b1)
    w2 = jnp.asarray(w2)
    b2 = jnp.asarray(b2)

    latent, hidden = w1.shape
    output = int(w2.shape[1])

    l_pad = _round_up(latent, 128)
    h_pad = _round_up(hidden, 128)
    # Lane-dense output tile; bounds VMEM independently of n_items and keeps
    # output-column padding waste small.
    tn_eff = _pick_tile(output, tn, 128)
    o_pad = _round_up(output, tn_eff)

    w1_p = jnp.pad(w1, ((0, l_pad - latent), (0, h_pad - hidden)))
    w1_p = w1_p.astype(jnp.bfloat16)
    b1_p = jnp.pad(b1, (0, h_pad - hidden)).astype(jnp.float32)
    b1_p = b1_p.reshape(1, h_pad)
    w2_p = jnp.pad(w2, ((0, h_pad - hidden), (0, o_pad - output)))
    w2_p = w2_p.astype(jnp.bfloat16)
    b2_p = jnp.pad(b2, (0, o_pad - output)).astype(jnp.float32)
    b2_p = b2_p.reshape(1, o_pad)
    return w1_p, b1_p, w2_p, b2_p, output, tn_eff


@functools.partial(jax.jit,
                   static_argnames=("output", "tn", "tm", "out_dtype"))
def _decoder_forward_padded(x, w1_p, b1_p, w2_p, b2_p, *, output, tn, tm,
                            out_dtype):
    l_pad, h_pad = w1_p.shape
    o_pad = w2_p.shape[1]
    latent = x.shape[-1]
    lead_shape = x.shape[:-1]

    x2d = x.reshape(-1, latent)
    m = x2d.shape[0]

    # Adaptive row tile: big enough to amortize per-step overhead, small
    # enough that padded-row output writes stay under ~12% waste.
    tm_eff = _pick_tile(m, tm, 8)
    m_pad = _round_up(m, tm_eff)

    if m_pad != m or l_pad != latent:
        x2d = jnp.pad(x2d, ((0, m_pad - m), (0, l_pad - latent)))
    x_p = x2d.astype(jnp.bfloat16)

    n_tiles = o_pad // tn
    m_tiles = m_pad // tm_eff
    # Output-column axis OUTERMOST: W2/b2 block index depends only on it, so
    # each W2 tile is streamed from HBM exactly once (reused across row tiles).
    grid = (n_tiles, m_tiles)

    out = pl.pallas_call(
        _decoder_kernel,
        out_shape=jax.ShapeDtypeStruct((m_pad, o_pad), out_dtype),
        grid_spec=pltpu.PrefetchScalarGridSpec(
            num_scalar_prefetch=0,
            grid=grid,
            in_specs=[
                pl.BlockSpec((tm_eff, l_pad), lambda n, i: (i, 0)),   # x rows
                pl.BlockSpec((l_pad, h_pad), lambda n, i: (0, 0)),    # W1
                pl.BlockSpec((1, h_pad), lambda n, i: (0, 0)),        # b1
                pl.BlockSpec((h_pad, tn), lambda n, i: (0, n)),       # W2 tile
                pl.BlockSpec((1, tn), lambda n, i: (0, n)),           # b2 tile
            ],
            out_specs=pl.BlockSpec((tm_eff, tn), lambda n, i: (i, n)),
        ),
        compiler_params=pltpu.CompilerParams(
            dimension_semantics=("parallel", "parallel"),
            vmem_limit_bytes=32 * 1024 * 1024),
    )(x_p, w1_p, b1_p, w2_p, b2_p)

    # Only slice when padding actually occurred (avoids an extra full-output
    # copy in the common already-aligned case).
    if m_pad != m or o_pad != output:
        out = out[:m, :output]
    return out.reshape(*lead_shape, output)


def decoder_forward(x, prepared_params, *, tm=512, out_dtype=None):
    """x: (..., latent); prepared_params from prepare_decoder_params().

    Returns (..., output) in out_dtype (default x.dtype; pass jnp.bfloat16 on
    v5e to halve the dominant output-write HBM stream if downstream allows)."""
    w1_p, b1_p, w2_p, b2_p, output, tn = prepared_params
    if out_dtype is None:
        out_dtype = x.dtype
    return _decoder_forward_padded(x, w1_p, b1_p, w2_p, b2_p,
                                   output=output, tn=tn, tm=tm,
                                   out_dtype=jnp.dtype(out_dtype))


def init_decoder_params(key, latent_size, hidden_size, output_size,
                        dtype=jnp.float32):
    """Params matching the PyTorch module (weights stored transposed)."""
    k1, k2, k3, k4 = jax.random.split(key, 4)

    def xavier_normal(k, fan_in, fan_out):
        std = (2.0 / (fan_in + fan_out)) ** 0.5
        w = std * jax.random.normal(k, (fan_out, fan_in), dtype=dtype)
        return w.T                                   # (in, out)

    def linear_bias(k, fan_in, fan_out):
        bound = 1.0 / (fan_in ** 0.5)
        return jax.random.uniform(k, (fan_out,), dtype=dtype,
                                  minval=-bound, maxval=bound)

    w1 = xavier_normal(k1, latent_size, hidden_size)   # (L, H)
    b1 = linear_bias(k2, latent_size, hidden_size)     # (H,)
    w2 = xavier_normal(k3, hidden_size, output_size)   # (H, O)
    b2 = linear_bias(k4, hidden_size, output_size)     # (O,)
    return w1, b1, w2, b2


def decoder_ref(x, w1, b1, w2, b2):
    h = jnp.tanh(x @ w1 + b1)
    return h @ w2 + b2


if __name__ == "__main__":
    latent_size, hidden_size, output_size = 32, 64, 300
    batch, seq = 2, 8

    key = jax.random.PRNGKey(0)
    kx, kp = jax.random.split(key)

    x = jax.random.normal(kx, (batch, seq, latent_size), dtype=jnp.float32)
    w1, b1, w2, b2 = init_decoder_params(kp, latent_size, hidden_size,
                                         output_size)

    # One-time param prep (padding + bf16 cast) outside the per-call hot path.
    params = prepare_decoder_params(w1, b1, w2, b2)

    y = decoder_forward(x, params)
    y = jax.block_until_ready(y)

    y_ref = decoder_ref(x, w1, b1, w2, b2)
    assert y.shape == (batch, seq, output_size), y.shape
    # bf16 matmul operands (f32 accumulation) -> loosened tolerance vs f32 ref.
    assert jnp.allclose(y, y_ref, atol=5e-2, rtol=5e-2), "mismatch vs reference"

    print("KERNEL_OK")
</pallas_src>

<mosaic_0001>
module attributes {stable_mosaic.version = 11 : i64} {
  func.func @_decoder_kernel(%arg0: i32, %arg1: i32, %arg2: memref<16x128xbf16, #tpu.memory_space<vmem>>, %arg3: memref<128x128xbf16, #tpu.memory_space<vmem>>, %arg4: memref<1x128xf32, #tpu.memory_space<vmem>>, %arg5: memref<128x128xbf16, #tpu.memory_space<vmem>>, %arg6: memref<1x128xf32, #tpu.memory_space<vmem>>, %arg7: memref<16x128xf32, #tpu.memory_space<vmem>>) attributes {dimension_semantics = [#tpu.dimension_semantics<parallel>, #tpu.dimension_semantics<parallel>], iteration_bounds = array<i64: 3, 1>, scalar_prefetch = 0 : i64, scratch_operands = 0 : i64, tpu.core_type = #tpu.core_type<tc>, window_params = [{transform_indices = @transform_0, window_bounds = array<i64: 16, 128>}, {pipeline_mode = #tpu.pipeline_mode<synchronous>, transform_indices = @transform_1, window_bounds = array<i64: 128, 128>}, {pipeline_mode = #tpu.pipeline_mode<synchronous>, transform_indices = @transform_2, window_bounds = array<i64: 1, 128>}, {transform_indices = @transform_3, window_bounds = array<i64: 128, 128>}, {transform_indices = @transform_4, window_bounds = array<i64: 1, 128>}, {transform_indices = @transform_5, window_bounds = array<i64: 16, 128>}]} {
    %c0 = arith.constant 0 : index
    %c0_0 = arith.constant 0 : index
    %0 = vector.load %arg2[%c0, %c0_0] : memref<16x128xbf16, #tpu.memory_space<vmem>>, vector<16x128xbf16>
    %c0_1 = arith.constant 0 : index
    %c0_2 = arith.constant 0 : index
    %1 = vector.load %arg3[%c0_1, %c0_2] : memref<128x128xbf16, #tpu.memory_space<vmem>>, vector<128x128xbf16>
    %cst = arith.constant dense<0.000000e+00> : vector<16x128xf32>
    %2 = tpu.matmul %0, %1, %cst {dimension_numbers = #tpu.dot_dimension_numbers<[1], [0], [0], [1], [0, 0, 1, 1], [], []>} : vector<16x128xbf16>, vector<128x128xbf16>, vector<16x128xf32> -> vector<16x128xf32>
    %c0_3 = arith.constant 0 : index
    %c0_4 = arith.constant 0 : index
    %3 = vector.load %arg4[%c0_3, %c0_4] : memref<1x128xf32, #tpu.memory_space<vmem>>, vector<1x128xf32>
    %4 = vector.broadcast %3 : vector<1x128xf32> to vector<16x128xf32>
    %5 = arith.addf %2, %4 : vector<16x128xf32>
    %6 = math.tanh %5 : vector<16x128xf32>
    %7 = arith.truncf %6 : vector<16x128xf32> to vector<16x128xbf16>
    %c0_5 = arith.constant 0 : index
    %c0_6 = arith.constant 0 : index
    %8 = vector.load %arg5[%c0_5, %c0_6] : memref<128x128xbf16, #tpu.memory_space<vmem>>, vector<128x128xbf16>
    %cst_7 = arith.constant dense<0.000000e+00> : vector<16x128xf32>
    %9 = tpu.matmul %7, %8, %cst_7 {dimension_numbers = #tpu.dot_dimension_numbers<[1], [0], [0], [1], [0, 0, 1, 1], [], []>} : vector<16x128xbf16>, vector<128x128xbf16>, vector<16x128xf32> -> vector<16x128xf32>
    %c0_8 = arith.constant 0 : index
    %c0_9 = arith.constant 0 : index
    %10 = vector.load %arg6[%c0_8, %c0_9] : memref<1x128xf32, #tpu.memory_space<vmem>>, vector<1x128xf32>
    %11 = vector.broadcast %10 : vector<1x128xf32> to vector<16x128xf32>
    %12 = arith.addf %9, %11 : vector<16x128xf32>
    %c0_10 = arith.constant 0 : index
    %c0_11 = arith.constant 0 : index
    %13 = vector.load %arg7[%c0_10, %c0_11] : memref<16x128xf32, #tpu.memory_space<vmem>>, vector<16x128xf32>
    tpu.vector_store %arg7[%c0_10, %c0_11], %12 {strides = array<i32>} : memref<16x128xf32, #tpu.memory_space<vmem>>, vector<16x128xf32>,
    return
  }
  func.func @transform_0(%arg0: i32, %arg1: i32) -> (i32, i32) {
    %c0_i32 = arith.constant 0 : i32
    %c0_i32_0 = arith.constant 0 : i32
    return %arg1, %c0_i32 : i32, i32
  }
  func.func @transform_1(%arg0: i32, %arg1: i32) -> (i32, i32) {
    %c0_i32 = arith.constant 0 : i32
    %c0_i32_0 = arith.constant 0 : i32
    %c0_i32_1 = arith.constant 0 : i32
    return %c0_i32, %c0_i32_0 : i32, i32
  }
  func.func @transform_2(%arg0: i32, %arg1: i32) -> (i32, i32) {
    %c0_i32 = arith.constant 0 : i32
    %c0_i32_0 = arith.constant 0 : i32
    %c0_i32_1 = arith.constant 0 : i32
    return %c0_i32, %c0_i32_0 : i32, i32
  }
  func.func @transform_3(%arg0: i32, %arg1: i32) -> (i32, i32) {
    %c0_i32 = arith.constant 0 : i32
    %c0_i32_0 = arith.constant 0 : i32
    return %c0_i32, %arg0 : i32, i32
  }
  func.func @transform_4(%arg0: i32, %arg1: i32) -> (i32, i32) {
    %c0_i32 = arith.constant 0 : i32
    %c0_i32_0 = arith.constant 0 : i32
    return %c0_i32, %arg0 : i32, i32
  }
  func.func @transform_5(%arg0: i32, %arg1: i32) -> (i32, i32) {
    %c0_i32 = arith.constant 0 : i32
    return %arg1, %arg0 : i32, i32
  }
}

</mosaic_0001>

<bundles_post_ra>
// kernel: _decoder_forward_padded.1
= control target key start
LH: loop header
LB: loop body
LE: loop exit
PB: predicated region body
PF: predicated region fallthrough
CT: control target
= control target key end

     0   :  { %s1123_s0 = inlined_call_operand.vmem [shape: bf16[16,128], index: 0, kind: input, shape index: {}]   ;;  %s1124_s1 = inlined_call_operand.hbm [shape: bf16[128,128], index: 1, kind: input, shape index: {}]   ;;  %s1125_s2 = inlined_call_operand.vmem [shape: f32[1,128], index: 2, kind: input, shape index: {}]   ;;  %s1126_s3 = inlined_call_operand.hbm [shape: bf16[128,384], index: 3, kind: input, shape index: {}]   ;;  %s1127_s4 = inlined_call_operand.vmem [shape: f32[1,384], index: 4, kind: input, shape index: {}]   ;;  %s1128_s5 = inlined_call_operand.vmem [shape: f32[16,384], index: 5, kind: output, shape index: {}]  }
   0x1   :  { %1131 = sst [smem:[#allocation9_spill]] %s1124_s1 }
   0x2   :  { %10 = vsyncpa [#allocation3], 0 }
   0x3   :  { %11 = vsyncpa [#allocation5], 0 }
   0x4   :  { %13 = vsyncpa [#allocation5 + $0x1], 0  ;;  %s968_s18 = smov 0   ;;  %s970_s19 = smov 0  }
   0x5   :  { %s972_s20 = smov 0   ;;  %s974_s21 = smov 0  }
   0x6   :  { %s976_s22 = smov 0   ;;  %s978_s23 = smov 0  }
   0x7 LB: > { %s642_s24 = sadd.s32 4294967295, %s932_s23   ;;  %p119_p0 = scmp.ne.s32.totalorder %s916_s19, %s912_s18  ;;  %s932_s23 = sphi %s978_s23, %s19_s23   ;;  %s928_s22 = sphi %s976_s22, %s1145_s22   ;;  %s924_s21 = sphi %s974_s21, %s1144_s21   ;;  %s920_s20 = sphi %s972_s20, %s1143_s20   ;;  %s916_s19 = sphi %s970_s19, %s1142_s19   ;;  %s912_s18 = sphi %s968_s18, %s1141_s18  }
   0x8   : > { %p998_p1 = scmp.eq.s32.totalorder %s642_s24, 0  ;;  %p1002_p2 = scmp.eq.s32.totalorder %s642_s24, 2 }
   0x9   : > { %p644_p3 = scmp.ge.s32.totalorder %s932_s23, 1  ;;  %p184_p4 = scmp.lt.s32.totalorder %s932_s23, 4 }
   0xa   : > { %p1010_p5 = por %p998_p1, %p119_p0  ;;  %s1136_s1 = sld [smem:[#allocation9_spill]] }
   0xb   : > { %p1014_p6 = pnand %p644_p3, %p184_p4  ;;  %s934_s7 = smov [#allocation2]  }
   0xc   : > { %s206_s8 = sshll.u32 %s934_s7, 4  ;;  %s1129_s9 = smov 64   ;;  %s207_s8 = int_to_ptr.vmem [resolvable:$true] %s206_s8 }
   0xd   : > { %p749_p7 = pneg %p1014_p6  ;;  %s1130_s10 = smov 4  }
   0xe   : > { %s31_s11 = sadd.s32 1, %s928_s22  ;;  %s106_s12 = sadd.s32 1, %s920_s20 }
   0xf   : > { %p750_p8 = pnand %p749_p7, %p998_p1  ;;  %p33_p9 = scmp.ge.s32.totalorder %s31_s11, 3 }
  0x10   : > { %s204_s6 = sshll.u32 %s1136_s1, 4  ;;  %p113_p10 = scmp.ne.s32.totalorder %s920_s20, %s916_s19  ;;  %s205_s6 = int_to_ptr.hbm [resolvable:$true] %s204_s6 }
  0x11   : > { %752 = dma.hbm_to_vmem [thread:$0]  (!%p750_p8), %s205_s6, 1024, %s207_s8, [#allocation3], %s1129_s9, %s1129_s9, %s1130_s10  }
  0x12   : > { %p114_p11 = scmp.eq.s32.totalorder %s932_s23, 0  ;;  %p758_p12 = scmp.lt.s32.totalorder %s932_s23, 3 }
  0x13   : > { %s1147_s11 = smov (%p33_p9, %s31_s11), 0  ;;  %p1042_p0 = por %p1002_p2, %p113_p10 }
  0x14   : > { %p1036_p13 = por %p114_p11, %p113_p10  ;;  %s103_s15 = ssub.s32 %s928_s22, %s1147_s11 }
  0x15   : > { %s223_s16 = sand.u32 1, %s920_s20   ;;  %p104_p3 = scmp.eq.s32.totalorder %s103_s15, 0 }
  0x16   : > { %s648_s17 = sshll.u32 %s223_s16, 6  ;;  %s649_s18 = sshll.u32 %s928_s22, 2 }
  0x17   : > { %s1051_s24 = scalar_select %p104_p3, %s920_s20, %s106_s12  }
  0x18   : > { %s231_s6 = scalar_lea.hbm %s1126_s3, %s649_s18  ;;  %s227_s8 = scalar_lea.vmem [#allocation4], %s648_s17 }
  0x19   : > { %s232_s7 = sshll.u32 %s231_s6, 4  ;;  %s234_s9 = sshll.u32 %s227_s8, 4  ;;  %s233_s7 = int_to_ptr.hbm [resolvable:$true] %s232_s7  ;;  %s235_s9 = int_to_ptr.vmem [resolvable:$true] %s234_s9 }
  0x1a   : > { %p754_p2 = pnand %p758_p12, %p1036_p13  ;;  %s224_s26 = scalar_lea.sflag [#allocation5], %s223_s16 }
  0x1b   : > { %s937_s10 = smov 192   ;;  %s1139_s1 = smov 4  }
  0x1c   : > { %s1140_s15 = smov 64   ;;  %252 = sbr.rel (%p1014_p6) target bundleno = 360 (0x168), region = 40 }
  0x1d   : > { %756 = dma.hbm_to_vmem [thread:$0]  (!%p754_p2), %s233_s7, 1024, %s235_s9, %s224_s26, %s937_s10, %s1140_s15, %s1139_s1  }
  0x21   : > { %903 = dma.done.wait (%p998_p1), [#allocation3], 1024  }
  0x22   : > { %905 = vsyncadd (%p998_p1), [#allocation3], 4294966272  ;;  %s1069_s12 = sand.u32 1, %s916_s19  }
  0x23   : > { %s652_s13 = sshll.u32 %s1069_s12, 6  ;;  %s260_s16 = scalar_lea.sflag [#allocation5], %s1069_s12 }
  0x24   : > { %s1073_s17 = scalar_lea.vmem [#allocation4], %s652_s13 }
  0x25   : > { %907 = dma.done.wait (%p1010_p5), %s260_s16, 1024  }
  0x26   : > { %909 = vsyncadd (%p1010_p5), %s260_s16, 4294966272  ;;  %v734_v0 = vld [vmem:[#allocation2 + $0x38] sm:$0xff]  ;;  %v733_v1 = vld [vmem:[#allocation2 + $0x30] sm:$0xff]  ;;  %p304_p1 = scmp.lt.s32.totalorder %s924_s21, 2  ;;  %s653_s30 = sshll.u32 %s1069_s12, 4 }
  0x27   : > { %384 = vmatpush.bf16.msra.mxu0 %v734_v0  ;;  %v742_v2 = vld [vmem:[%s1073_s17 + $0x38] sm:$0xff]  ;;  %v741_v3 = vld [vmem:[%s1073_s17 + $0x30] sm:$0xff]  ;;  %v732_v4 = vld [vmem:[#allocation2 + $0x28] sm:$0xff]  ;;  %s297_s6 = scalar_lea.vmem [#allocation6], %s653_s30  ;;  %s723_s7 = sshll.u32 (%p1042_p0), %s924_s21, 3 }
  0x28   : > { %469 = vmatpush.bf16.msra.mxu1 %v742_v2  ;;  %v740_v5 = vld [vmem:[%s1073_s17 + $0x28] sm:$0xff]  ;;  %v731_v6 = vld [vmem:[#allocation2 + $0x20] sm:$0xff]  ;;  %v730_v7 = vld [vmem:[#allocation2 + $0x18] sm:$0xff]  ;;  %s305_s27 = scalar_select %p304_p1, %s924_s21, 2 }
  0x29   : > { %v729_v8 = vld [vmem:[#allocation2 + $0x10] sm:$0xff]  ;;  %v728_v9 = vld [vmem:[#allocation2 + $0x8] sm:$0xff]  ;;  %v727_v10 = vld [vmem:[#allocation2] sm:$0xff]  ;;  %s496_s15 = scalar_lea.vmem (%p1042_p0), %s1128_s5, %s723_s7 }
  0x2a   : > { %v726_v11 = vld [vmem:[%s1123_s0] sm:$0xff]  ;;  %s306_s10 = scalar_lea.vmem %s1127_s4, %s305_s27  ;;  %v738_v13 = vld [vmem:[%s1073_s17 + $0x18] sm:$0xff]  ;;  %v737_v14 = vld [vmem:[%s1073_s17 + $0x10] sm:$0xff] }
  0x2b   : > { %385 = vmatpush.bf16.msra.mxu0 %v733_v1  ;;  %v739_v12 = vld [vmem:[%s1073_s17 + $0x20] sm:$0xff]  ;;  %v736_v15 = vld [vmem:[%s1073_s17 + $0x8] sm:$0xff] }
  0x2c   : > { %470 = vmatpush.bf16.msra.mxu1 %v741_v3  ;;  %v735_v16 = vld [vmem:[%s1073_s17] sm:$0xff] }
  0x2d   : > { %v812_v18 = vld [vmem:[%s1125_s2] ss:$0 sm:$0xff] }
  0x2e   : > { %v813_v25 = vld [vmem:[%s306_s10] ss:$0 sm:$0xff] }
  0x2f   : > { %386 = vmatpush.bf16.msra.mxu0 %v732_v4 }
  0x30   : > { %471 = vmatpush.bf16.msra.mxu1 %v740_v5 }
  0x33   : > { %387 = vmatpush.bf16.msra.mxu0 %v731_v6 }
  0x34   : > { %472 = vmatpush.bf16.msra.mxu1 %v739_v12 }
  0x37   : > { %388 = vmatpush.bf16.msra.mxu0 %v730_v7 }
  0x38   : > { %473 = vmatpush.bf16.msra.mxu1 %v738_v13 }
  0x3b   : > { %389 = vmatpush.bf16.msra.mxu0 %v729_v8 }
  0x3c   : > { %474 = vmatpush.bf16.msra.mxu1 %v737_v14 }
  0x3f   : > { %390 = vmatpush.bf16.msra.mxu0 %v728_v9 }
  0x40   : > { %475 = vmatpush.bf16.msra.mxu1 %v736_v15 }
  0x43   : > { %391 = vmatpush.bf16.msra.mxu0 %v727_v10 }
  0x44   : > { %476 = vmatpush.bf16.msra.mxu1 %v735_v16 }
  0x46   : > { %392 = vmatmul.bf16.vlgmr.msra.gmra.mxu0 %v726_v11 }
  0xc3   : > { %v393_v17 = vpop.f32.mrf.mxu0 }
  0xc4   : > { %v394_v19 = vadd.f32 %v812_v18, %v393_v17 }
  0xc6   : > { %814 = vtanh.f32 %v394_v19 }
  0xcb   : > { %v395_v20 = vpop.f32.mrf.mxu0 }
  0xcc   : > { %v396_v21 = vadd.f32 %v812_v18, %v395_v20  ;;  %v815_v22 = vpop.eup %814 }
  0xce   : > { %816 = vtanh.f32 %v396_v21 }
  0xd4   : > { %v817_v23 = vpop.eup %816 }
  0xd5   : > { %v400_v24 = vpack.c.bf16 %v817_v23, %v815_v22 }
  0xd7   : > { %477 = vmatmul.bf16.vlgmr.msra.gmra.mxu1 %v400_v24 }
 0x154   : > { %v478_v26 = vpop.f32.mrf.mxu1 }
 0x155   : > { %v479_v27 = vadd.f32 %v813_v25, %v478_v26 }
 0x157   : > { %483 = vst [vmem:[%s297_s6] sm:$0xff] %v479_v27 }
 0x15b   : > { %491 = sbr.rel (!%p1042_p0) target bundleno = 360 (0x168), region = 52 }
 0x15c   : > { %v480_v28 = vpop.f32.mrf.mxu1 }
 0x15d   : > { %v481_v29 = vadd.f32 %v813_v25, %v480_v28 }
 0x15e   : > { %v527_v30 = vld [vmem:[%s297_s6] sm:$0xff] (%p1042_p0) }
 0x15f   : > { %484 = vst [vmem:[%s297_s6 + $0x8] sm:$0xff] %v481_v29 }
 0x160   : > { %528 = vst [vmem:[%s496_s15] sm:$0xff] %v527_v30 }
 0x166   : > { %v529_v31 = vld [vmem:[%s297_s6 + $0x8] sm:$0xff] }
 0x167   : > { %530 = vst [vmem:[%s496_s15 + $0x18] sm:$0xff] %v529_v31 }
 0x168 PF: > { %s19_s23 = sadd.s32 1, %s932_s23   ;;  %s1141_s18 = smov %s916_s19 }
 0x169   : > { %p16_p4 = scmp.ge.s32.totalorder %s19_s23, 5   ;;  %s1142_s19 = smov %s920_s20 }
 0x16a   : > { %s1143_s20 = smov %s1051_s24  ;;  %s1144_s21 = smov %s928_s22 }
 0x16b   : > { %s1145_s22 = smov %s1147_s11  ;;  %18 = sbr.rel (!%p16_p4) target bundleno = 7 (0x7), region = 129 }
 0x170   :  { %546 = vsyncpa [#allocation3], 1 }
 0x171   :  { %548 = vsyncpa [#allocation3 + $0x1], 1 }
 0x172   :  { %549 = vsyncpa [#allocation5], 1 }
 0x173   :  { %551 = vsyncpa [#allocation5 + $0x1], 1 }

</bundles_post_ra>
